<compile_context>
chip_gen: v7x
topology: tpu7x:2x2x1
jax: 0.10.0
libtpu: 0.0.40
codegen_flags: <defaults>
</compile_context>

<pallas_src>
import functools
import math

import jax
import jax.numpy as jnp
from jax import lax
from jax.experimental import pallas as pl
from jax.experimental.pallas import tpu as pltpu


# ----------------------------------------------------------------------------
# Chip-aware VMEM budgeting (v5e/v6e: 128 MiB physical, v7x: 64 MiB per TC).
# ----------------------------------------------------------------------------
def _vmem_capacity_bytes(default=64 << 20):
    try:
        info = pltpu.get_tpu_info()
    except Exception:
        return default
    for name in ("vmem_capacity_bytes", "vmem_size_bytes", "vmem_bytes"):
        v = getattr(info, name, None)
        if v:
            return int(v)
    return default


_VMEM_CAP = _vmem_capacity_bytes()
# Scoped-VMEM limit handed to Mosaic (safely under physical on every chip).
_VMEM_LIMIT = min(int(_VMEM_CAP * 0.7), 100 << 20)
# Budget used when choosing tile sizes (headroom for compiler scratch/spills).
_TILE_BUDGET = max(int(_VMEM_CAP * 0.4), 8 << 20)


# ----------------------------------------------------------------------------
# Tiled linear kernel:  y = x @ W + b
#   W stored (d_in, d_out) bf16 and kept VMEM-resident, bias (1, d_out) f32.
#   bf16 MXU inputs, f32 accumulation.
# ----------------------------------------------------------------------------
def _linear_kernel(x_ref, w_ref, b_ref, o_ref):
    x = x_ref[...].astype(jnp.bfloat16)
    acc = jnp.dot(x, w_ref[...], preferred_element_type=jnp.float32)
    o_ref[...] = (acc + b_ref[...]).astype(o_ref.dtype)


def _pick_row_tile(n_rows, d_in, d_out, x_bytes, out_bytes,
                   budget_bytes=_TILE_BUDGET, max_tile=512):
    """Row tile keeping double-buffered x/out blocks + resident bf16 W in VMEM."""
    # Resident bf16 weight is still default double-buffered by the pipeline;
    # bf16 storage halves that waste relative to f32 weights.
    w_bytes = 2 * (2 * d_in * d_out) + 4 * d_out
    per_row = 2 * (x_bytes * d_in + out_bytes * d_out)   # 2-buffered x + out blocks
    avail = max(budget_bytes - w_bytes, 16 * per_row)
    tile = max(8, min(max_tile, (int(avail) // per_row) // 8 * 8))
    return int(n_rows) if n_rows <= tile else int(tile)


def linear(x, w_bf16, b, out_dtype):
    """x: (N, d_in), w_bf16: (d_in, d_out) bf16, b: (d_out,) -> (N, d_out)."""
    N, d_in = x.shape
    d_out = w_bf16.shape[1]
    b2 = b.reshape(1, d_out).astype(jnp.float32)
    tile = _pick_row_tile(N, d_in, d_out, x.dtype.itemsize,
                          jnp.dtype(out_dtype).itemsize)
    return pl.pallas_call(
        _linear_kernel,
        out_shape=jax.ShapeDtypeStruct((N, d_out), out_dtype),
        grid=(pl.cdiv(N, tile),),
        in_specs=[
            pl.BlockSpec((tile, d_in), lambda i: (i, 0)),
            pl.BlockSpec((d_in, d_out), lambda i: (0, 0)),   # resident bf16 weights
            pl.BlockSpec((1, d_out), lambda i: (0, 0)),      # resident f32 bias
        ],
        out_specs=pl.BlockSpec((tile, d_out), lambda i: (i, 0)),
        compiler_params=pltpu.CompilerParams(
            dimension_semantics=("parallel",),
            vmem_limit_bytes=_VMEM_LIMIT),
    )(x, w_bf16, b2)


# ----------------------------------------------------------------------------
# Fused FullAttention + output projection.
#   Grid = (B, n_groups); per step: packed-head attention for `hp` heads, then
#   matmul against the matching Wo row-slice and accumulate into the resident
#   (L, d_model) f32 output block ("arbitrary" group axis).
# ----------------------------------------------------------------------------
def _pick_head_pack(n_heads, d_keys, d_values, L, S, d_model,
                    budget_bytes=_TILE_BUDGET, max_pack=8):
    """Largest head packing whose lane widths are multiples of 128 and whose
    per-step live VMEM fits the budget; falls back to full H (always legal)."""
    def step_bytes(hp):
        qkv = 2 * 2 * (L * hp * d_keys + S * hp * (d_keys + d_values))  # bf16, 2-buf
        wo = 2 * 2 * hp * d_values * d_model                            # bf16, 2-buf
        out = 2 * 4 * L * d_model                                       # f32, 2-buf
        live = 4 * L * S + 8 * L * hp * d_values + 4 * d_model          # scores etc.
        return qkv + wo + out + live

    best = None
    for hp in range(1, min(n_heads, max_pack) + 1):
        if n_heads % hp:
            continue
        if (hp * d_keys) % 128 or (hp * d_values) % 128:
            continue
        if step_bytes(hp) <= budget_bytes:
            best = hp
    return best if best is not None else n_heads


def _attention_out_kernel(q_ref, k_ref, v_ref, wo_ref, bo_ref, o_ref, *,
                          hp, d_keys, d_values, scale):
    g = pl.program_id(1)

    @pl.when(g == 0)
    def _():
        # Initialize the resident output block with the out-projection bias.
        o_ref[0] = jnp.broadcast_to(bo_ref[...], o_ref.shape[1:]).astype(o_ref.dtype)

    q = q_ref[0] * scale              # (L, hp*dk) bf16; scale folded into q
    k = k_ref[0]                      # (S, hp*dk) bf16
    v = v_ref[0]                      # (S, hp*dv) bf16

    outs = []
    for h in range(hp):               # static unroll over packed heads
        qh = q[:, h * d_keys:(h + 1) * d_keys]
        kh = k[:, h * d_keys:(h + 1) * d_keys]
        vh = v[:, h * d_values:(h + 1) * d_values]
        # (L, E) x (S, E) contracted on E — no explicit k.T, f32 accumulate.
        s = lax.dot_general(qh, kh, (((1,), (1,)), ((), ())),
                            preferred_element_type=jnp.float32)
        m = jnp.max(s, axis=-1, keepdims=True)
        p = jnp.exp(s - m)
        p = p * pl.reciprocal(jnp.sum(p, axis=-1, keepdims=True), approx=True)
        outs.append(jnp.dot(p.astype(jnp.bfloat16), vh,
                            preferred_element_type=jnp.float32))

    grp = jnp.concatenate(outs, axis=-1).astype(jnp.bfloat16)     # (L, hp*dv)
    # Fused out-projection row-slice; accumulate in the resident f32 output.
    o_ref[0] += jnp.dot(grp, wo_ref[...], preferred_element_type=jnp.float32)


def attention_out(q, k, v, wo_bf16, bo, n_heads, d_keys, d_values, out_dtype,
                  hp=None, k_block_off=0, v_block_off=0):
    """q/k/v: head-packed (B, T, ...) bf16 (possibly the same packed array with
    lane-block offsets); wo_bf16: (H*Dv, d_model) bf16 -> (B, L, d_model)."""
    B, L, _ = q.shape
    _, S, _ = k.shape
    d_model = wo_bf16.shape[1]
    if hp is None:
        hp = _pick_head_pack(n_heads, d_keys, d_values, L, S, d_model)
    n_groups = n_heads // hp
    bo2 = bo.reshape(1, d_model).astype(jnp.float32)
    kernel = functools.partial(_attention_out_kernel, hp=hp, d_keys=d_keys,
                               d_values=d_values,
                               scale=1.0 / math.sqrt(d_keys))
    return pl.pallas_call(
        kernel,
        out_shape=jax.ShapeDtypeStruct((B, L, d_model), out_dtype),
        grid=(B, n_groups),
        in_specs=[
            pl.BlockSpec((1, L, hp * d_keys), lambda b, g: (b, 0, g)),
            pl.BlockSpec((1, S, hp * d_keys),
                         lambda b, g: (b, 0, k_block_off + g)),
            pl.BlockSpec((1, S, hp * d_values),
                         lambda b, g: (b, 0, v_block_off + g)),
            pl.BlockSpec((hp * d_values, d_model), lambda b, g: (g, 0)),
            pl.BlockSpec((1, d_model), lambda b, g: (0, 0)),
        ],
        out_specs=pl.BlockSpec((1, L, d_model), lambda b, g: (b, 0, 0)),
        compiler_params=pltpu.CompilerParams(
            dimension_semantics=("parallel", "arbitrary"),
            vmem_limit_bytes=_VMEM_LIMIT),
    )(q, k, v, wo_bf16, bo2)


# ----------------------------------------------------------------------------
# AttentionLayer forward
# ----------------------------------------------------------------------------
def attention_layer(queries, keys, values, params, n_heads, attn_mask=None):
    # TODO(synk): attn_mask (TriangularCausalMask / ProbMask) is not applied.
    B, L, d_model = queries.shape
    _, S, _ = keys.shape
    H = n_heads
    HDk = params["wq"].shape[1]
    HDv = params["wv"].shape[1]
    d_keys = HDk // H
    d_values = HDv // H

    bf16 = jnp.bfloat16
    wq = params["wq"].astype(bf16)
    wk = params["wk"].astype(bf16)
    wv = params["wv"].astype(bf16)
    wo = params["wo"].astype(bf16)

    hp = _pick_head_pack(H, d_keys, d_values, L, S, d_model)
    lane_aligned = (hp * d_keys) % 128 == 0 and (hp * d_values) % 128 == 0
    fused_w_bytes = 2 * 2 * d_model * (2 * HDk + HDv)   # 2-buffered bf16 QKV weight
    packed_ok = (lane_aligned and (2 * HDk) % (hp * d_values) == 0
                 and fused_w_bytes <= _TILE_BUDGET // 2)

    if (queries is keys) and (keys is values) and packed_ok:
        # Self-attention fast path: one fused QKV projection writes a single
        # packed bf16 array; the attention kernel reads q/k/v straight out of
        # it via lane-block-offset index maps (no slice copies).
        wqkv = jnp.concatenate([wq, wk, wv], axis=1)
        bqkv = jnp.concatenate([params["bq"], params["bk"], params["bv"]], axis=0)
        qkv = linear(queries.reshape(B * L, d_model), wqkv, bqkv, bf16)
        qkv3 = qkv.reshape(B, L, 2 * HDk + HDv)
        return attention_out(qkv3, qkv3, qkv3, wo, params["bo"], H,
                             d_keys, d_values, queries.dtype, hp=hp,
                             k_block_off=HDk // (hp * d_keys),
                             v_block_off=(2 * HDk) // (hp * d_values))

    # General path: three tiled bf16 projections, then fused attention+out-proj.
    q = linear(queries.reshape(B * L, d_model), wq, params["bq"], bf16).reshape(B, L, HDk)
    k = linear(keys.reshape(B * S, d_model), wk, params["bk"], bf16).reshape(B, S, HDk)
    v = linear(values.reshape(B * S, d_model), wv, params["bv"], bf16).reshape(B, S, HDv)
    return attention_out(q, k, v, wo, params["bo"], H, d_keys, d_values,
                         queries.dtype, hp=hp)


# ----------------------------------------------------------------------------
# Deterministic parameter init (matches nn.Linear shapes; uniform(+-1/sqrt(in)))
# ----------------------------------------------------------------------------
def init_params(key, d_model, n_heads, d_keys=None, d_values=None):
    d_keys = d_keys or d_model // n_heads
    d_values = d_values or d_model // n_heads

    def lin_init(k, d_in, d_out):
        kw, kb = jax.random.split(k)
        bound = 1.0 / math.sqrt(d_in)
        # stored as (d_in, d_out) == transpose of PyTorch's (out, in) weight
        w = jax.random.uniform(kw, (d_in, d_out), jnp.float32, -bound, bound)
        b = jax.random.uniform(kb, (d_out,), jnp.float32, -bound, bound)
        return w, b

    kq, kk, kv, ko = jax.random.split(key, 4)
    wq, bq = lin_init(kq, d_model, d_keys * n_heads)
    wk, bk = lin_init(kk, d_model, d_keys * n_heads)
    wv, bv = lin_init(kv, d_model, d_values * n_heads)
    wo, bo = lin_init(ko, d_values * n_heads, d_model)
    return dict(wq=wq, bq=bq, wk=wk, bk=bk, wv=wv, bv=bv, wo=wo, bo=bo)


if __name__ == "__main__":
    B, L, S = 2, 8, 8
    d_model, n_heads = 32, 4

    key = jax.random.PRNGKey(0)
    kp, kq, kk, kv = jax.random.split(key, 4)

    params = init_params(kp, d_model, n_heads)
    queries = jax.random.normal(kq, (B, L, d_model), jnp.float32)
    keys_in = jax.random.normal(kk, (B, S, d_model), jnp.float32)
    values = jax.random.normal(kv, (B, S, d_model), jnp.float32)

    # Cross-attention style inputs (three tiled projections + fused attention).
    out = attention_layer(queries, keys_in, values, params, n_heads)
    jax.block_until_ready(out)
    assert out.shape == (B, L, d_model)

    # Self-attention at a lane width that is not 128-aligned (general path).
    out_self = attention_layer(queries, queries, queries, params, n_heads)
    jax.block_until_ready(out_self)
    assert out_self.shape == (B, L, d_model)

    # Lane-aligned self-attention: fused packed-QKV projection + direct packed
    # reads in the fused attention/out-projection kernel.
    d_model2, n_heads2 = 512, 8
    kp2, kx2 = jax.random.split(jax.random.PRNGKey(1))
    params2 = init_params(kp2, d_model2, n_heads2)
    x2 = jax.random.normal(kx2, (2, 8, d_model2), jnp.float32)
    out2 = attention_layer(x2, x2, x2, params2, n_heads2)
    jax.block_until_ready(out2)
    assert out2.shape == (2, 8, d_model2)

    print("KERNEL_OK")
</pallas_src>

<mosaic_0001>
module attributes {stable_mosaic.version = 11 : i64} {
  func.func @_linear_kernel(%arg0: i32, %arg1: memref<16x32xf32, #tpu.memory_space<vmem>>, %arg2: memref<32x32xbf16, #tpu.memory_space<vmem>>, %arg3: memref<1x32xf32, #tpu.memory_space<vmem>>, %arg4: memref<16x32xbf16, #tpu.memory_space<vmem>>) attributes {dimension_semantics = [#tpu.dimension_semantics<parallel>], iteration_bounds = array<i64: 1>, scalar_prefetch = 0 : i64, scratch_operands = 0 : i64, tpu.core_type = #tpu.core_type<tc>, window_params = [{transform_indices = @transform_0, window_bounds = array<i64: 16, 32>}, {pipeline_mode = #tpu.pipeline_mode<synchronous>, transform_indices = @transform_1, window_bounds = array<i64: 32, 32>}, {pipeline_mode = #tpu.pipeline_mode<synchronous>, transform_indices = @transform_2, window_bounds = array<i64: 1, 32>}, {transform_indices = @transform_3, window_bounds = array<i64: 16, 32>}]} {
    %c0 = arith.constant 0 : index
    %c0_0 = arith.constant 0 : index
    %0 = vector.load %arg1[%c0, %c0_0] : memref<16x32xf32, #tpu.memory_space<vmem>>, vector<16x32xf32>
    %1 = arith.truncf %0 : vector<16x32xf32> to vector<16x32xbf16>
    %c0_1 = arith.constant 0 : index
    %c0_2 = arith.constant 0 : index
    %2 = vector.load %arg2[%c0_1, %c0_2] : memref<32x32xbf16, #tpu.memory_space<vmem>>, vector<32x32xbf16>
    %cst = arith.constant dense<0.000000e+00> : vector<16x32xf32>
    %3 = tpu.matmul %1, %2, %cst {dimension_numbers = #tpu.dot_dimension_numbers<[1], [0], [0], [1], [0, 0, 1, 1], [], []>} : vector<16x32xbf16>, vector<32x32xbf16>, vector<16x32xf32> -> vector<16x32xf32>
    %c0_3 = arith.constant 0 : index
    %c0_4 = arith.constant 0 : index
    %4 = vector.load %arg3[%c0_3, %c0_4] : memref<1x32xf32, #tpu.memory_space<vmem>>, vector<1x32xf32>
    %5 = vector.broadcast %4 : vector<1x32xf32> to vector<16x32xf32>
    %6 = arith.addf %3, %5 : vector<16x32xf32>
    %7 = arith.truncf %6 : vector<16x32xf32> to vector<16x32xbf16>
    %c0_5 = arith.constant 0 : index
    %c0_6 = arith.constant 0 : index
    %8 = vector.load %arg4[%c0_5, %c0_6] : memref<16x32xbf16, #tpu.memory_space<vmem>>, vector<16x32xbf16>
    tpu.vector_store %arg4[%c0_5, %c0_6], %7 {strides = array<i32>} : memref<16x32xbf16, #tpu.memory_space<vmem>>, vector<16x32xbf16>,
    return
  }
  func.func @transform_0(%arg0: i32) -> (i32, i32) {
    %c0_i32 = arith.constant 0 : i32
    %c0_i32_0 = arith.constant 0 : i32
    return %arg0, %c0_i32 : i32, i32
  }
  func.func @transform_1(%arg0: i32) -> (i32, i32) {
    %c0_i32 = arith.constant 0 : i32
    %c0_i32_0 = arith.constant 0 : i32
    %c0_i32_1 = arith.constant 0 : i32
    return %c0_i32, %c0_i32_0 : i32, i32
  }
  func.func @transform_2(%arg0: i32) -> (i32, i32) {
    %c0_i32 = arith.constant 0 : i32
    %c0_i32_0 = arith.constant 0 : i32
    %c0_i32_1 = arith.constant 0 : i32
    return %c0_i32, %c0_i32_0 : i32, i32
  }
  func.func @transform_3(%arg0: i32) -> (i32, i32) {
    %c0_i32 = arith.constant 0 : i32
    %c0_i32_0 = arith.constant 0 : i32
    return %arg0, %c0_i32 : i32, i32
  }
}

</mosaic_0001>

<bundles_post_ra>
// kernel: tpu_custom_call.1
= control target key start
LH: loop header
LB: loop body
LE: loop exit
PB: predicated region body
PF: predicated region fallthrough
CT: control target
= control target key end

     0   :  { %8 = vsyncpa [#allocation3], 0  ;;  %s320_s0 = inlined_call_operand.hbm [shape: f32[16,32], index: 0, kind: input, shape index: {}]   ;;  %s321_s1 = inlined_call_operand.hbm [shape: bf16[32,32], index: 1, kind: input, shape index: {}]   ;;  %s322_s2 = inlined_call_operand.vmem [shape: f32[1,32], index: 2, kind: input, shape index: {}]   ;;  %s323_s3 = inlined_call_operand.hbm [shape: bf16[16,32], index: 3, kind: output, shape index: {}]  }
   0x1   :  { %9 = vsyncpa [#allocation6], 0 }
   0x2   :  { %10 = vsyncpa [#allocation4], 0  ;;  %s246_s12 = smov [#allocation2]   ;;  %s174_s16 = scalar_lea.hbm %s320_s0, 256 }
   0x3   :  { %s16_s13 = sshll.u32 %s246_s12, 4  ;;  %p175_p0 = scmp.ne.s32.totalorder %s320_s0, %s174_s16  ;;  %s17_s13 = int_to_ptr.vmem [resolvable:$true] %s16_s13 }
   0x4   :  { %p178_p1 = scmp.lt.u32.totalorder %s174_s16, %s320_s0 }
   0x6   :  { %p180_p2 = pnand %p178_p1, %p175_p0 }
   0x8   :  { %183 = shalt.err (!%p180_p2)
}
   0x9   :  { %s184_s21 = scalar_lea.vmem %s17_s13, 256  ;;  %p189_p4 = scmp.lt.s32.totalorder %s17_s13, %s17_s13 }
   0xa   :  { %p185_p3 = scmp.ne.s32.totalorder %s17_s13, %s184_s21  ;;  %p190_p5 = scmp.lt.s32.totalorder %s184_s21, %s184_s21 }
   0xc   :  { %p191_p6 = por %p190_p5, %p189_p4 }
   0xe   :  { %p192_p7 = pnand %p191_p6, %p185_p3 }
  0x10   :  { %195 = shalt.err (!%p192_p7)
}
  0x11   :  { %s247_s22 = smov 128   ;;  %s248_s23 = smov 8  }
  0x12   :  { %22 = dma.hbm_to_vmem [thread:$0]  %s320_s0, 256, %s17_s13, [#allocation3], %s247_s22, %s247_s22, %s248_s23  }
  0x13   :  { %s249_s26 = smov [#allocation5]   ;;  %s196_s30 = scalar_lea.hbm %s321_s1, 256 }
  0x14   :  { %s28_s27 = sshll.u32 %s249_s26, 4  ;;  %p197_p8 = scmp.ne.s32.totalorder %s321_s1, %s196_s30  ;;  %s29_s27 = int_to_ptr.vmem [resolvable:$true] %s28_s27 }
  0x15   :  { %p200_p9 = scmp.lt.u32.totalorder %s196_s30, %s321_s1 }
  0x17   :  { %p202_p10 = pnand %p200_p9, %p197_p8 }
  0x19   :  { %205 = shalt.err (!%p202_p10)
}
  0x1a   :  { %s206_s8 = scalar_lea.vmem %s29_s27, 256  ;;  %p211_p12 = scmp.lt.s32.totalorder %s29_s27, %s29_s27 }
  0x1b   :  { %p207_p11 = scmp.ne.s32.totalorder %s29_s27, %s206_s8  ;;  %p212_p13 = scmp.lt.s32.totalorder %s206_s8, %s206_s8 }
  0x1d   :  { %p213_p0 = por %p212_p13, %p211_p12 }
  0x1f   :  { %p214_p1 = pnand %p213_p0, %p207_p11 }
  0x21   :  { %217 = shalt.err (!%p214_p1)
}
  0x22   :  { %s250_s0 = smov 64   ;;  %s251_s9 = smov 4  }
  0x23   :  { %34 = dma.hbm_to_vmem [thread:$0]  %s321_s1, 256, %s29_s27, [#allocation6], %s250_s0, %s250_s0, %s251_s9  }
  0x24   :  { %240 = dma.done.wait [#allocation3], 256  }
  0x25   :  { %241 = vsyncadd [#allocation3], 4294967040 }
  0x26   :  { %242 = dma.done.wait [#allocation6], 256  }
  0x27   :  { %243 = vsyncadd [#allocation6], 4294967040  ;;  %v252_v0 = vmov 0.0   ;;  %vm253_vm0 = vmmov 0   ;;  %v172_v1 = vld [vmem:[#allocation5] sm:$0xff]   ;;  %v173_v2 = vld [vmem:[#allocation5 + $0x8] sm:$0xff]  }
  0x28   :  { %155 = vmatprep.subr.bf16.mxu0 %v252_v0  ;;  %159 = vmatprep.mubr.msk.bf16.mxu0 %vm253_vm0, %v252_v0  ;;  %v44_v3 = vld [vmem:[#allocation2] sm:$0xff]  ;;  %v45_v4 = vld [vmem:[#allocation2 + $0x8] sm:$0xff]  ;;  %vm70_vm1 = vcmask 261120   ;;  %vm123_vm2 = vcmask 257024   ;;  %s254_s13 = smov [#allocation7]  }
  0x29   :  { %156 = vmatpush3.bf16.msra.mxu0 %v172_v1  ;;  %v46_v5 = vpack.c.bf16 %v45_v4, %v44_v3  ;;  %v144_v6 = vld [vmem:[%s322_s2] ss:$0 sm:$0xff]  ;;  %s131_s14 = sshll.u32 %s254_s13, 4  ;;  %s132_s14 = int_to_ptr.vmem [resolvable:$true] %s131_s14 }
  0x2a   :  { %157 = vmatprep.subr.bf16.mxu0 %v252_v0  ;;  %s218_s15 = scalar_lea.vmem %s132_s14, 128  ;;  %p223_p3 = scmp.lt.s32.totalorder %s132_s14, %s132_s14 }
  0x2b   :  { %p219_p2 = scmp.ne.s32.totalorder %s132_s14, %s218_s15  ;;  %p224_p4 = scmp.lt.s32.totalorder %s218_s15, %s218_s15 }
  0x2d   :  { %158 = vmatpush3.bf16.msra.mxu0 %v173_v2  ;;  %p225_p5 = por %p224_p4, %p223_p3 }
  0x2f   :  { %p226_p6 = pnand %p225_p5, %p219_p2 }
  0x30   :  { %160 = vmatmul.mubr.msk.bf16.vlgmr.msra.gmra.mrb[0].mxu0 %vm70_vm1, %v46_v5 }
 0x103   :  { %v108_v7 = vpop.f32.mrb[0].mxu0 }
 0x104   :  { %v109_v8 = vadd.f32 %v144_v6, %v108_v7  ;;  %v161_v9 = vpop.f32.mrb[1].mxu0 }
 0x105   :  { %v111_v10 = vpop.f32.mrb[2].mxu0 }
 0x106   :  { %v150_v11 = vpack.c.bf16 %v109_v8, %v109_v8  ;;  %v112_v12 = vadd.f32 %v144_v6, %v111_v10  ;;  %v162_v13 = vpop.f32.mrb[3].mxu0 }
 0x108   :  { %v151_v14 = vpack.c.bf16 %v112_v12, %v112_v12  ;;  %124 = vst.msk [vmem:[#allocation7] sm:$0xf] %vm123_vm2, %v150_v11 }
 0x10a   :  { %125 = vst.msk [vmem:[#allocation7 + $0x4] sm:$0xf] %vm123_vm2, %v151_v14 }
 0x10b   :  { %229 = shalt.err (!%p226_p6)
}
 0x10c   :  { %s230_s17 = scalar_lea.hbm %s323_s3, 128 }
 0x10d   :  { %p231_p7 = scmp.ne.s32.totalorder %s323_s3, %s230_s17  ;;  %p234_p8 = scmp.lt.u32.totalorder %s230_s17, %s323_s3 }
 0x10f   :  { %p236_p9 = pnand %p234_p8, %p231_p7 }
 0x111   :  { %239 = shalt.err (!%p236_p9)
}
 0x112   :  { %137 = dma.vmem_to_hbm [thread:$0]  %s132_s14, 128, %s323_s3, [#allocation4], %s250_s0, %s250_s0, %s251_s9  }
 0x113   :  { %244 = dma.done.wait [#allocation4], 128  }
 0x114   :  { %245 = vsyncadd [#allocation4], 4294967168 }
 0x115   :  { %141 = vsyncpa [#allocation3], 1 }
 0x116   :  { %142 = vsyncpa [#allocation6], 1 }
 0x117   :  { %143 = vsyncpa [#allocation4], 1 }

</bundles_post_ra>
